<compile_context>
chip_gen: v5e
topology: v5e:2x2
jax: 0.10.0
libtpu: 0.0.40
codegen_flags: <defaults>
</compile_context>

<pallas_src>
import functools

import numpy as np
import jax
import jax.numpy as jnp
from jax import lax
from jax.experimental import pallas as pl
from jax.experimental.pallas import tpu as pltpu

ANGLE_PRIOR_IDXS = (55, 58, 12, 15)
ANGLE_PRIOR_SIGNS = (1.0, -1.0, -1.0, -1.0)
POSE_DIM = 72  # (23 + 1) * 3


def _round_up(x: int, m: int) -> int:
    return ((x + m - 1) // m) * m


def _hinge_kernel(pose_ref, out_ref, *, d, idxs, weights):
    # pose_ref: (TB, d) in the caller's dtype; out_ref: (TB, 4) f32.
    pose = pose_ref[...].astype(jnp.float32)  # in-kernel upcast (free on VPU)

    # Compile-time (d, 4) selection matrix with 2*sign folded in, built from
    # iota so it lowers to constants — no HBM->VMEM DMA, no extra input.
    n = len(idxs)
    row = lax.broadcasted_iota(jnp.int32, (d, n), 0)
    col = lax.broadcasted_iota(jnp.int32, (d, n), 1)
    sel = jnp.zeros((d, n), jnp.float32)
    for j in range(n):  # statically unrolled (n == 4)
        sel = jnp.where((row == idxs[j]) & (col == j),
                        jnp.float32(weights[j]), sel)

    # (TB, 4) == 2 * pose[:, idxs] * signs   (MXU)
    gathered = jnp.dot(pose, sel, preferred_element_type=jnp.float32)
    # exp(2x) == exp(x)**2  (EUP; the squaring vmul was folded into the weights)
    out_ref[...] = jnp.exp(gathered)


def hinge_joint_prior(pose: jax.Array,
                      with_global_pose: bool = True,
                      block_rows: int = 512) -> jax.Array:
    """pose: (B, 72) (or (B, 69) body-only) axis-angle SMPL pose -> (B, 4) f32."""
    assert pose.ndim == 2
    B, D = pose.shape

    idxs = tuple(int(i) - (0 if with_global_pose else 3) for i in ANGLE_PRIOR_IDXS)
    weights = tuple(2.0 * float(s) for s in ANGLE_PRIOR_SIGNS)
    n_out = len(idxs)
    assert 0 <= min(idxs) and max(idxs) < D, (
        f"pose dim {D} too small for hinge indices {idxs} "
        f"(with_global_pose={with_global_pose})")

    # Batch tile: multiple of 8 sublanes, capped so VMEM stays bounded for any B.
    tb = min(_round_up(block_rows, 8), _round_up(B, 8))
    grid = (pl.cdiv(B, tb),)

    kernel = functools.partial(_hinge_kernel, d=D, idxs=idxs, weights=weights)

    return pl.pallas_call(
        kernel,
        out_shape=jax.ShapeDtypeStruct((B, n_out), jnp.float32),
        grid=grid,
        in_specs=[pl.BlockSpec((tb, D), lambda i: (i, 0))],
        out_specs=pl.BlockSpec((tb, n_out), lambda i: (i, 0)),
        compiler_params=pltpu.CompilerParams(
            dimension_semantics=("parallel",),  # shards batch across TCs on v7x
        ),
    )(pose)  # native dtype; cast happens in-kernel


if __name__ == "__main__":
    key = jax.random.PRNGKey(0)
    B = 2
    pose = jax.random.normal(key, (B, POSE_DIM), dtype=jnp.float32)

    idxs = jnp.asarray(ANGLE_PRIOR_IDXS)
    signs = jnp.asarray(ANGLE_PRIOR_SIGNS, dtype=jnp.float32)

    # with_global_pose=True, f32 input
    out = jax.block_until_ready(hinge_joint_prior(pose, with_global_pose=True))
    ref = jnp.exp(pose[:, idxs] * signs) ** 2
    assert out.shape == (B, 4)
    np.testing.assert_allclose(np.asarray(out), np.asarray(ref), rtol=1e-5, atol=1e-5)

    # with_global_pose=False: body-only 69-dim pose, indices shifted by -3
    pose69 = jax.random.normal(jax.random.PRNGKey(1), (B, POSE_DIM - 3),
                               dtype=jnp.float32)
    out69 = jax.block_until_ready(hinge_joint_prior(pose69, with_global_pose=False))
    ref69 = jnp.exp(pose69[:, idxs - 3] * signs) ** 2
    np.testing.assert_allclose(np.asarray(out69), np.asarray(ref69),
                               rtol=1e-5, atol=1e-5)

    # bf16 input path: upcast happens inside the kernel (no wrapper f32 copy)
    pose_bf16 = pose.astype(jnp.bfloat16)
    out_bf16 = jax.block_until_ready(hinge_joint_prior(pose_bf16))
    ref_bf16 = jnp.exp(pose_bf16.astype(jnp.float32)[:, idxs] * signs) ** 2
    np.testing.assert_allclose(np.asarray(out_bf16), np.asarray(ref_bf16),
                               rtol=1e-4, atol=1e-4)

    print("KERNEL_OK")
</pallas_src>

<mosaic_0001>
module attributes {stable_mosaic.version = 11 : i64} {
  func.func @_hinge_kernel(%arg0: i32, %arg1: memref<8x72xf32, #tpu.memory_space<vmem>>, %arg2: memref<8x4xf32, #tpu.memory_space<vmem>>) attributes {dimension_semantics = [#tpu.dimension_semantics<parallel>], iteration_bounds = array<i64: 1>, scalar_prefetch = 0 : i64, scratch_operands = 0 : i64, tpu.core_type = #tpu.core_type<tc>, window_params = [{transform_indices = @transform_0, window_bounds = array<i64: 8, 72>}, {transform_indices = @transform_1, window_bounds = array<i64: 8, 4>}]} {
    %c0 = arith.constant 0 : index
    %c0_0 = arith.constant 0 : index
    %0 = vector.load %arg1[%c0, %c0_0] : memref<8x72xf32, #tpu.memory_space<vmem>>, vector<8x72xf32>
    %1 = tpu.iota {dimensions = array<i32: 0>} : vector<72x4xi32>
    %2 = tpu.iota {dimensions = array<i32: 1>} : vector<72x4xi32>
    %cst = arith.constant 0.000000e+00 : f32
    %3 = vector.broadcast %cst : f32 to vector<72x4xf32>
    %c55_i32 = arith.constant 55 : i32
    %4 = vector.broadcast %c55_i32 : i32 to vector<72x4xi32>
    %5 = arith.cmpi eq, %1, %4 : vector<72x4xi32>
    %c0_i32 = arith.constant 0 : i32
    %6 = vector.broadcast %c0_i32 : i32 to vector<72x4xi32>
    %7 = arith.cmpi eq, %2, %6 : vector<72x4xi32>
    %8 = arith.andi %5, %7 : vector<72x4xi1>
    %cst_1 = arith.constant 2.000000e+00 : f32
    %9 = vector.broadcast %cst_1 : f32 to vector<72x4xf32>
    %10 = arith.select %8, %9, %3 : vector<72x4xi1>, vector<72x4xf32>
    %c58_i32 = arith.constant 58 : i32
    %11 = vector.broadcast %c58_i32 : i32 to vector<72x4xi32>
    %12 = arith.cmpi eq, %1, %11 : vector<72x4xi32>
    %c1_i32 = arith.constant 1 : i32
    %13 = vector.broadcast %c1_i32 : i32 to vector<72x4xi32>
    %14 = arith.cmpi eq, %2, %13 : vector<72x4xi32>
    %15 = arith.andi %12, %14 : vector<72x4xi1>
    %cst_2 = arith.constant -2.000000e+00 : f32
    %16 = vector.broadcast %cst_2 : f32 to vector<72x4xf32>
    %17 = arith.select %15, %16, %10 : vector<72x4xi1>, vector<72x4xf32>
    %c12_i32 = arith.constant 12 : i32
    %18 = vector.broadcast %c12_i32 : i32 to vector<72x4xi32>
    %19 = arith.cmpi eq, %1, %18 : vector<72x4xi32>
    %c2_i32 = arith.constant 2 : i32
    %20 = vector.broadcast %c2_i32 : i32 to vector<72x4xi32>
    %21 = arith.cmpi eq, %2, %20 : vector<72x4xi32>
    %22 = arith.andi %19, %21 : vector<72x4xi1>
    %cst_3 = arith.constant -2.000000e+00 : f32
    %23 = vector.broadcast %cst_3 : f32 to vector<72x4xf32>
    %24 = arith.select %22, %23, %17 : vector<72x4xi1>, vector<72x4xf32>
    %c15_i32 = arith.constant 15 : i32
    %25 = vector.broadcast %c15_i32 : i32 to vector<72x4xi32>
    %26 = arith.cmpi eq, %1, %25 : vector<72x4xi32>
    %c3_i32 = arith.constant 3 : i32
    %27 = vector.broadcast %c3_i32 : i32 to vector<72x4xi32>
    %28 = arith.cmpi eq, %2, %27 : vector<72x4xi32>
    %29 = arith.andi %26, %28 : vector<72x4xi1>
    %cst_4 = arith.constant -2.000000e+00 : f32
    %30 = vector.broadcast %cst_4 : f32 to vector<72x4xf32>
    %31 = arith.select %29, %30, %24 : vector<72x4xi1>, vector<72x4xf32>
    %cst_5 = arith.constant dense<0.000000e+00> : vector<8x4xf32>
    %32 = tpu.matmul %0, %31, %cst_5 {dimension_numbers = #tpu.dot_dimension_numbers<[1], [0], [0], [1], [0, 0, 1, 1], [], []>} : vector<8x72xf32>, vector<72x4xf32>, vector<8x4xf32> -> vector<8x4xf32>
    %33 = math.exp %32 : vector<8x4xf32>
    %c0_6 = arith.constant 0 : index
    %c0_7 = arith.constant 0 : index
    %34 = vector.load %arg2[%c0_6, %c0_7] : memref<8x4xf32, #tpu.memory_space<vmem>>, vector<8x4xf32>
    tpu.vector_store %arg2[%c0_6, %c0_7], %33 {strides = array<i32>} : memref<8x4xf32, #tpu.memory_space<vmem>>, vector<8x4xf32>,
    return
  }
  func.func @transform_0(%arg0: i32) -> (i32, i32) {
    %c0_i32 = arith.constant 0 : i32
    %c0_i32_0 = arith.constant 0 : i32
    return %arg0, %c0_i32 : i32, i32
  }
  func.func @transform_1(%arg0: i32) -> (i32, i32) {
    %c0_i32 = arith.constant 0 : i32
    %c0_i32_0 = arith.constant 0 : i32
    return %arg0, %c0_i32 : i32, i32
  }
}

</mosaic_0001>

<bundles_post_ra>
// kernel: tpu_custom_call.1
= control target key start
LH: loop header
LB: loop body
LE: loop exit
PB: predicated region body
PF: predicated region fallthrough
CT: control target
= control target key end

     0   :  { %6 = vsyncpa [#allocation3], 0  ;;  %s290_s0 = inlined_call_operand.hbm [shape: f32[2,72], index: 0, kind: input, shape index: {}]   ;;  %s291_s1 = inlined_call_operand.hbm [shape: f32[2,4], index: 1, kind: output, shape index: {}]  }
   0x1   :  { %7 = vsyncpa [#allocation4], 0 }
   0x2   :  { %11 = vsyncadd [#allocation3], 96  ;;  %s12_s8 = sshll.u32 %s290_s0, 4  ;;  %s261_s9 = smov [#allocation2]   ;;  %v26_v0 = vlaneseq  ;;  %s13_s8 = int_to_ptr.hbm [resolvable:$true] %s12_s8 }
   0x3   :  { %s14_s10 = sshll.u32 %s261_s9, 4  ;;  %s262_s11 = smov 32   ;;  %s15_s10 = int_to_ptr.vmem [resolvable:$true] %s14_s10 }
   0x4   :  { %s263_s12 = smov 2  }
   0x5   :  { %20 = dma.hbm_to_vmem [thread:$0]  %s13_s8, 32, %s15_s10, [#allocation3], %s262_s11, %s262_s11, %s263_s12  }
   0x6   :  { %257 = dma.done.wait [#allocation3], 128  }
   0x7   :  { %258 = vsyncadd [#allocation3], 4294967168  ;;  %v27_v1 = vshrl.u32 %v26_v0, 7  ;;  %v37_v2 = vand.u32 127, %v26_v0  ;;  %v264_v6 = vmov -2.0   ;;  %v265_v7 = vmov 2.0  }
   0x8   :  { %v266_v8 = vmov 0.0   ;;  %v25_v11 = vld [vmem:[#allocation2] sm:$0xff]  ;;  %vm150_vm12 = vcmask 588800   ;;  %vm176_vm13 = vcmask 31744  }
   0x9   :  { %v34_v3 = vadd.s32 56, %v27_v1  ;;  %vm75_vm0 = vcmp.eq.s32.totalorder %v37_v2, 1  ;;  %v33_v4 = vadd.s32 48, %v27_v1  ;;  %vm47_vm1 = vcmp.eq.s32.totalorder %v37_v2, 0 }
   0xa   :  { %v28_v5 = vadd.s32 8, %v27_v1  ;;  %vm103_vm7 = vcmp.eq.s32.totalorder %v37_v2, 2  ;;  %vm131_vm10 = vcmp.eq.s32.totalorder %v37_v2, 3 }
   0xb   :  { %vm73_vm2 = vcmp.eq.s32.totalorder %v34_v3, 58  ;;  %vm44_vm3 = vcmp.eq.s32.totalorder %v33_v4, 55 }
   0xc   :  { %vm83_vm4 = vmand %vm73_vm2, %vm75_vm0  ;;  %vm95_vm6 = vcmp.eq.s32.totalorder %v28_v5, 12  ;;  %vm123_vm9 = vcmp.eq.s32.totalorder %v28_v5, 15 }
   0xd   :  { %197 = vmatpush.msk.msra.mxu0 %vm83_vm4, %v264_v6  ;;  %vm54_vm5 = vmand %vm44_vm3, %vm47_vm1 }
   0xe   :  { %vm105_vm8 = vmand %vm95_vm6, %vm103_vm7 }
   0xf   :  { %198 = vmatpush.msk.msra.mxu0 %vm54_vm5, %v265_v7  ;;  %v114_v9 = vsel %vm105_vm8, -2.0, %v266_v8  ;;  %vm133_vm11 = vmand %vm123_vm9, %vm131_vm10 }
  0x10   :  { %v142_v10 = vsel %vm133_vm11, -2.0, %v114_v9 }
  0x11   :  { %164 = vmatpush.msra.mxu0 %v266_v8 }
  0x13   :  { %165 = vmatpush.msra.mxu0 %v266_v8 }
  0x15   :  { %166 = vmatpush.msra.mxu0 %v266_v8 }
  0x17   :  { %167 = vmatpush.msra.mxu0 %v266_v8 }
  0x19   :  { %168 = vmatpush.msra.mxu0 %v142_v10 }
  0x1b   :  { %169 = vmatpush.msra.mxu0 %v266_v8 }
  0x1c   :  { %199 = vmatmul.msk.f32.vlgmr.msra.gmra.mxu0 %vm150_vm12, %v25_v11 }
  0x99   :  { %v171_v12 = vpop.f32.mrf.mxu0 }
  0x9a   :  { %v174_v13 = vmul.f32 1.442695, %v171_v12 }
  0x9c   :  { %207 = vpow2.f32 %v174_v13 }
  0xa2   :  { %v208_v14 = vpop.eup %207 }
  0xa3   :  { %177 = vst.msk [vmem:[#allocation5] sm:$0xff] %vm176_vm13, %v208_v14 }
  0xa4   :  { %181 = vsyncadd [#allocation4], 96  ;;  %s184_s14 = sshll.u32 %s291_s1, 4  ;;  %s267_s15 = smov [#allocation5]   ;;  %s185_s14 = int_to_ptr.hbm [resolvable:$true] %s184_s14 }
  0xa5   :  { %s182_s16 = sshll.u32 %s267_s15, 4  ;;  %s183_s16 = int_to_ptr.vmem [resolvable:$true] %s182_s16 }
  0xa6   :  { %190 = dma.vmem_to_hbm [thread:$0]  %s183_s16, 32, %s185_s14, [#allocation4], %s262_s11, %s262_s11, %s263_s12  }
  0xa7   :  { %259 = dma.done.wait [#allocation4], 128  }
  0xa8   :  { %260 = vsyncadd [#allocation4], 4294967168 }
  0xa9   :  { %195 = vsyncpa [#allocation3], 1 }
  0xaa   :  { %196 = vsyncpa [#allocation4], 1 }

</bundles_post_ra>
